<compile_context>
chip_gen: v6e
topology: v6e:2x2x1
jax: 0.10.0
libtpu: 0.0.40
codegen_flags: <defaults>
</compile_context>

<pallas_src>
import functools

import numpy as np
import jax
import jax.numpy as jnp
from jax.experimental import pallas as pl
from jax.experimental.pallas import tpu as pltpu


_EPS = 1e-4
_LOG_EPS = float(np.log(_EPS))            # log(1e-4)
_LOG_1MEPS = float(np.log1p(-_EPS))       # log(1 - 1e-4)


# ----------------------------- Pallas kernels ------------------------------

def _sum_to_lane_row(a):
    """Reduce (..., H, W) -> (1, W) using only leading-dim / sublane sums."""
    while a.ndim > 2:
        a = jnp.sum(a, axis=0)
    return jnp.sum(a, axis=0, keepdims=True)


def _focal_partial_kernel(logit_ref, gt_ref, out_ref):
    """Per-block CenterNet focal-loss partial sums, native NCHW blocks.

    Block in : (bn, C, H, W) logits and gt.
    Block out: (1, 2, W) — row 0 = per-lane loss partial, row 1 = per-lane npos.
    The wrapper finishes the reduction over blocks and lanes, so this kernel
    never performs a cross-lane XLU reduce or a lane-scatter select.
    """
    x = logit_ref[...].astype(jnp.float32)
    gt = gt_ref[...].astype(jnp.float32)

    # clamp(sigmoid(x), 1e-4, 1-1e-4) with 2 full-precision EUP ops/element:
    #   t        = exp(-x)            (EUP; exponent clamped against overflow)
    #   pred     = 1/(1+t)            (approx vrcp + one Newton step, VPU-only)
    #   log(p)   = -log(1+t)          (EUP)
    #   log(1-p) = log(p) - x         (log-sigmoid identity, VPU-only)
    # Clipping in the log domain reproduces net_utils.sigmoid's clamp exactly.
    t = jnp.exp(jnp.minimum(-x, 60.0))
    u = 1.0 + t
    r = pl.reciprocal(u, approx=True)
    r = r * (2.0 - u * r)                       # Newton refinement -> ~f32 accurate
    pred = jnp.clip(r, _EPS, 1.0 - _EPS)
    log_p = jnp.clip(-jnp.log(u), _LOG_EPS, _LOG_1MEPS)
    log_1mp = jnp.clip(log_p - x, _LOG_EPS, _LOG_1MEPS)

    is_pos = gt == 1.0
    is_neg = gt < 1.0                           # gt > 1 contributes nothing (matches ref)
    pos_f = is_pos.astype(jnp.float32)
    pos_term = log_p * (1.0 - pred) ** 2
    neg_term = log_1mp * pred * pred * (1.0 - gt) ** 4
    loss = jnp.where(is_pos, pos_term, jnp.where(is_neg, neg_term, 0.0))

    out_ref[0, 0:1, :] = _sum_to_lane_row(loss)
    out_ref[0, 1:2, :] = _sum_to_lane_row(pos_f)


def _poly_losses_kernel(pred_ref, init_ref, gt_ref,
                        wh_ref, py_ref, shape_ref, *, weights):
    """Fused polygon losses (wh / py / shape) in one gridless call.

    pred_ref : (n_pred, N, 2P) stacked refinement predictions
    init_ref : (N, 2P) poly_init
    gt_ref   : (N, 2P) ground-truth polygon
    Outputs (SMEM scalars): wh smooth-l1 mean, weighted py sum, weighted shape sum.
    """
    gt = gt_ref[...].astype(jnp.float32)                 # (N, 2P)
    pd = gt.shape[-1]

    # "Roll the points by one" permutation (out[:, k] = in[:, (k+2) % 2P]) built
    # in-register from iota: no HBM rmat input, no host-side construction.  The
    # MXU is idle in this kernel, so the tiny (2P, 2P) matmul is effectively free.
    row = jax.lax.broadcasted_iota(jnp.int32, (pd, pd), 0)
    col = jax.lax.broadcasted_iota(jnp.int32, (pd, pd), 1)
    shifted = col + 2
    roll_m = jnp.logical_or(row == shifted, row == shifted - pd).astype(jnp.float32)

    def sl1_mean(d):
        ad = jnp.abs(d)
        l = jnp.where(ad < 1.0, 0.5 * d * d, ad - 0.5)
        return jnp.sum(l) * (1.0 / d.size)

    # smooth_l1(poly_init, i_gt_py), reduction='mean'  (0.1 scale applied outside)
    wh_ref[0] = sl1_mean(init_ref[...].astype(jnp.float32) - gt)

    py_sum = jnp.float32(0.0)
    shape_sum = jnp.float32(0.0)
    for i, w in enumerate(weights):          # n_pred is small & static -> unrolled
        d = pred_ref[i].astype(jnp.float32) - gt          # (N, 2P)
        py_sum = py_sum + w * sl1_mean(d)
        # pred_shape - tar_shape == roll(p - gt) - (p - gt) == roll(d) - d,
        # so only one permutation matmul per refinement is needed.
        d_roll = jnp.dot(d, roll_m, preferred_element_type=jnp.float32)
        shape_sum = shape_sum + w * sl1_mean(d_roll - d)

    py_ref[0] = py_sum
    shape_ref[0] = shape_sum


# --------------------------- kernel call wrappers ---------------------------

def focal_loss_nchw(logits, gt, *, target_block_bytes=2 << 20,
                    vmem_limit_bytes=64 << 20):
    """CenterNet focal loss of sigmoid(logits) vs gt on a native NCHW heatmap.

    No staging pad / reshape / concatenate: the heatmap is DMA'd exactly once.
    Blocks keep the full (H, W) minor dims (always legal regardless of H, W or
    dtype) and fold as many batch slices as fit ~target_block_bytes per input.
    """
    n, c, h, w = logits.shape
    per_n = c * h * w * logits.dtype.itemsize
    bn = 1
    for d in range(1, n + 1):                 # largest divisor of n that fits target
        if n % d == 0 and d * per_n <= target_block_bytes:
            bn = d
    grid = n // bn
    # TODO(synk): for very large C*H*W (single batch slice >> target) also tile over C.

    parts = pl.pallas_call(
        _focal_partial_kernel,
        out_shape=jax.ShapeDtypeStruct((grid, 2, w), jnp.float32),
        grid=(grid,),
        in_specs=[pl.BlockSpec((bn, c, h, w), lambda i: (i, 0, 0, 0)),
                  pl.BlockSpec((bn, c, h, w), lambda i: (i, 0, 0, 0))],
        out_specs=pl.BlockSpec((1, 2, w), lambda i: (i, 0, 0)),
        compiler_params=pltpu.CompilerParams(
            # "parallel" lets the runtime shard the batch-block axis across
            # TensorCores on v7x; escalate to pltpu.CORE_PARALLEL if xprof
            # shows an idle core.
            dimension_semantics=("parallel",),
            vmem_limit_bytes=vmem_limit_bytes),
    )(logits, gt)

    loss_sum = jnp.sum(parts[:, 0, :])
    npos = jnp.sum(parts[:, 1, :])
    return jnp.where(npos == 0.0, -loss_sum, -loss_sum / jnp.maximum(npos, 1.0))


def poly_losses(poly_init, py_pred_stack, i_gt_py):
    """Fused wh / py / shape polygon losses in a single gridless pallas_call.

    py_pred_stack: (n_pred, N, P, 2); poly_init, i_gt_py: (N, P, 2).
    Returns (wh_loss_mean, py_loss, shape_loss) with 1/n_pred averaging applied.
    Polygon data is tiny (a few hundred KB even for real instance counts), so it
    stays fully VMEM-resident.
    # TODO(synk): if the instance count grows enough to pressure v7x's 64 MiB VMEM,
    # tile this over N with a (rows, 2P) BlockSpec and accumulate in scratch.
    """
    n_pred, n, p, two = py_pred_stack.shape
    pd = p * two
    pred2 = py_pred_stack.reshape(n_pred, n, pd)   # tiny wrapper-side reshapes
    init2 = poly_init.reshape(n, pd)
    gt2 = i_gt_py.reshape(n, pd)

    weights = tuple(0.8 ** (n_pred - i - 1) for i in range(n_pred))
    kernel = functools.partial(_poly_losses_kernel, weights=weights)

    wh, py_s, sh_s = pl.pallas_call(
        kernel,
        out_shape=(jax.ShapeDtypeStruct((1,), jnp.float32),
                   jax.ShapeDtypeStruct((1,), jnp.float32),
                   jax.ShapeDtypeStruct((1,), jnp.float32)),
        in_specs=[pl.BlockSpec(memory_space=pltpu.VMEM),   # pred stack
                  pl.BlockSpec(memory_space=pltpu.VMEM),   # poly_init
                  pl.BlockSpec(memory_space=pltpu.VMEM)],  # gt
        out_specs=(pl.BlockSpec(memory_space=pltpu.SMEM),
                   pl.BlockSpec(memory_space=pltpu.SMEM),
                   pl.BlockSpec(memory_space=pltpu.SMEM)),
    )(pred2, init2, gt2)

    return wh[0], py_s[0] / n_pred, sh_s[0] / n_pred


# ------------------------- NetworkWrapper.forward ---------------------------

def network_wrapper_forward(output, batch):
    scalar_stats = {}
    loss = jnp.float32(0.0)

    mask_loss = focal_loss_nchw(output['mask'], batch['cmask'])
    scalar_stats['mask_loss'] = mask_loss
    loss = loss + mask_loss

    ct_loss = focal_loss_nchw(output['ct_hm'], batch['ct_hm'])
    scalar_stats['ct_loss'] = ct_loss
    loss = loss + ct_loss

    # all polygon losses fused into one pallas_call (stacking the preds copies
    # only a few hundred bytes/KB of data)
    py_pred = jnp.stack(output['py_pred'], axis=0)
    wh_loss, py_loss, shape_loss = poly_losses(output['poly_init'], py_pred,
                                               output['i_gt_py'])
    scalar_stats['wh_loss'] = 0.1 * wh_loss
    loss = loss + 0.1 * wh_loss
    scalar_stats['py_loss'] = py_loss
    scalar_stats['shape_loss'] = shape_loss
    loss = loss + py_loss + shape_loss

    scalar_stats['loss'] = loss
    image_stats = {}
    return output, loss, scalar_stats, image_stats


# ------------------------------ pure-JAX reference ---------------------------

def _focal_ref(logits, gt):
    pred = jnp.clip(jax.nn.sigmoid(logits.astype(jnp.float32)), 1e-4, 1.0 - 1e-4)
    gt = gt.astype(jnp.float32)
    pos = (gt == 1.0).astype(jnp.float32)
    neg = (gt < 1.0).astype(jnp.float32)
    nw = (1.0 - gt) ** 4
    pls = jnp.sum(jnp.log(pred) * (1.0 - pred) ** 2 * pos)
    nls = jnp.sum(jnp.log(1.0 - pred) * pred ** 2 * nw * neg)
    npos = jnp.sum(pos)
    return jnp.where(npos == 0.0, -nls, -(pls + nls) / jnp.maximum(npos, 1.0))


def _sl1_ref(p, t):
    d = p.astype(jnp.float32) - t.astype(jnp.float32)
    ad = jnp.abs(d)
    return jnp.mean(jnp.where(ad < 1.0, 0.5 * d * d, ad - 0.5))


def _forward_ref(output, batch):
    stats = {}
    stats['mask_loss'] = _focal_ref(output['mask'], batch['cmask'])
    stats['ct_loss'] = _focal_ref(output['ct_hm'], batch['ct_hm'])
    wh_loss = _sl1_ref(output['poly_init'], output['i_gt_py'])
    stats['wh_loss'] = 0.1 * wh_loss
    gt = output['i_gt_py']
    tar_shape = jnp.concatenate([gt[:, 1:], gt[:, :1]], axis=1) - gt
    n_pred = len(output['py_pred'])
    py_loss = 0.0
    shape_loss = 0.0
    for i, pred in enumerate(output['py_pred']):
        w = 0.8 ** (n_pred - i - 1)
        py_loss += w * _sl1_ref(pred, gt)
        pred_shape = jnp.concatenate([pred[:, 1:], pred[:, :1]], axis=1) - pred
        shape_loss += w * _sl1_ref(pred_shape, tar_shape)
    stats['py_loss'] = py_loss / n_pred
    stats['shape_loss'] = shape_loss / n_pred
    stats['loss'] = (stats['mask_loss'] + stats['ct_loss'] + stats['wh_loss']
                     + stats['py_loss'] + stats['shape_loss'])
    return stats


# ----------------------------------- main ------------------------------------

if __name__ == "__main__":
    key = jax.random.PRNGKey(0)
    kmask, kcm, kct, kcth, kgt, kpi, kp0, kp1, kp2 = jax.random.split(key, 9)

    N, Cm, Cc, H, W = 2, 1, 4, 16, 16
    P, n_pred = 8, 3

    # synthetic backbone outputs (logits) and targets
    mask_logits = jax.random.normal(kmask, (N, Cm, H, W), jnp.float32)
    cmask = jax.random.uniform(kcm, (N, Cm, H, W), jnp.float32) ** 2
    cmask = cmask.at[:, :, 4, 4].set(1.0).at[:, :, 10, 9].set(1.0)

    ct_hm_logits = jax.random.normal(kct, (N, Cc, H, W), jnp.float32)
    ct_hm_gt = jax.random.uniform(kcth, (N, Cc, H, W), jnp.float32) ** 4
    ct_hm_gt = ct_hm_gt.at[:, :, 3, 12].set(1.0)

    i_gt_py = jax.random.uniform(kgt, (N, P, 2), jnp.float32, minval=0.0, maxval=4.0)
    poly_init = i_gt_py + 1.5 * jax.random.normal(kpi, (N, P, 2), jnp.float32)
    py_pred = [
        i_gt_py + 1.2 * jax.random.normal(kp0, (N, P, 2), jnp.float32),
        i_gt_py + 0.6 * jax.random.normal(kp1, (N, P, 2), jnp.float32),
        i_gt_py + 0.3 * jax.random.normal(kp2, (N, P, 2), jnp.float32),
    ]

    output = {
        'mask': mask_logits,
        'ct_hm': ct_hm_logits,
        'poly_init': poly_init,
        'i_gt_py': i_gt_py,
        'py_pred': py_pred,
    }
    batch = {'cmask': cmask, 'ct_hm': ct_hm_gt}

    out, loss, scalar_stats, image_stats = network_wrapper_forward(output, batch)
    loss = jax.block_until_ready(loss)
    jax.block_until_ready(scalar_stats)

    # verify against a pure-JAX reference of the PyTorch semantics
    ref_stats = _forward_ref(output, batch)
    for k in ['mask_loss', 'ct_loss', 'wh_loss', 'py_loss', 'shape_loss', 'loss']:
        np.testing.assert_allclose(np.asarray(scalar_stats[k]),
                                   np.asarray(ref_stats[k]),
                                   rtol=1e-3, atol=1e-5, err_msg=k)

    print("KERNEL_OK")
</pallas_src>

<mosaic_0001>
module attributes {stable_mosaic.version = 11 : i64} {
  func.func @_focal_partial_kernel(%arg0: i32, %arg1: memref<2x1x16x16xf32, #tpu.memory_space<vmem>>, %arg2: memref<2x1x16x16xf32, #tpu.memory_space<vmem>>, %arg3: memref<1x2x16xf32, #tpu.memory_space<vmem>>) attributes {dimension_semantics = [#tpu.dimension_semantics<parallel>], iteration_bounds = array<i64: 1>, scalar_prefetch = 0 : i64, scratch_operands = 0 : i64, tpu.core_type = #tpu.core_type<tc>, window_params = [{transform_indices = @transform_0, window_bounds = array<i64: 2, 1, 16, 16>}, {transform_indices = @transform_1, window_bounds = array<i64: 2, 1, 16, 16>}, {transform_indices = @transform_2, window_bounds = array<i64: 1, 2, 16>}]} {
    %c0 = arith.constant 0 : index
    %c0_0 = arith.constant 0 : index
    %c0_1 = arith.constant 0 : index
    %c0_2 = arith.constant 0 : index
    %0 = vector.load %arg1[%c0, %c0_0, %c0_1, %c0_2] : memref<2x1x16x16xf32, #tpu.memory_space<vmem>>, vector<2x1x16x16xf32>
    %c0_3 = arith.constant 0 : index
    %c0_4 = arith.constant 0 : index
    %c0_5 = arith.constant 0 : index
    %c0_6 = arith.constant 0 : index
    %1 = vector.load %arg2[%c0_3, %c0_4, %c0_5, %c0_6] : memref<2x1x16x16xf32, #tpu.memory_space<vmem>>, vector<2x1x16x16xf32>
    %cst = arith.constant 0.000000e+00 : f32
    %2 = vector.broadcast %cst : f32 to vector<2x1x16x16xf32>
    %3 = arith.subf %2, %0 : vector<2x1x16x16xf32>
    %cst_7 = arith.constant 6.000000e+01 : f32
    %4 = vector.broadcast %cst_7 : f32 to vector<2x1x16x16xf32>
    %5 = arith.minimumf %3, %4 : vector<2x1x16x16xf32>
    %6 = math.exp %5 : vector<2x1x16x16xf32>
    %cst_8 = arith.constant 1.000000e+00 : f32
    %7 = vector.broadcast %cst_8 : f32 to vector<2x1x16x16xf32>
    %8 = arith.addf %7, %6 : vector<2x1x16x16xf32>
    %9 = tpu.reciprocal %8 {approx = true} : vector<2x1x16x16xf32> -> vector<2x1x16x16xf32>
    %10 = arith.mulf %8, %9 : vector<2x1x16x16xf32>
    %cst_9 = arith.constant 2.000000e+00 : f32
    %11 = vector.broadcast %cst_9 : f32 to vector<2x1x16x16xf32>
    %12 = arith.subf %11, %10 : vector<2x1x16x16xf32>
    %13 = arith.mulf %9, %12 : vector<2x1x16x16xf32>
    %cst_10 = arith.constant 9.99999974E-5 : f32
    %cst_11 = arith.constant 0.999899983 : f32
    %14 = vector.broadcast %cst_10 : f32 to vector<2x1x16x16xf32>
    %15 = arith.maximumf %14, %13 : vector<2x1x16x16xf32>
    %16 = vector.broadcast %cst_11 : f32 to vector<2x1x16x16xf32>
    %17 = arith.minimumf %16, %15 : vector<2x1x16x16xf32>
    %18 = math.log %8 : vector<2x1x16x16xf32>
    %cst_12 = arith.constant 0.000000e+00 : f32
    %19 = vector.broadcast %cst_12 : f32 to vector<2x1x16x16xf32>
    %20 = arith.subf %19, %18 : vector<2x1x16x16xf32>
    %cst_13 = arith.constant -9.21034049 : f32
    %cst_14 = arith.constant -1.000050e-04 : f32
    %21 = vector.broadcast %cst_13 : f32 to vector<2x1x16x16xf32>
    %22 = arith.maximumf %21, %20 : vector<2x1x16x16xf32>
    %23 = vector.broadcast %cst_14 : f32 to vector<2x1x16x16xf32>
    %24 = arith.minimumf %23, %22 : vector<2x1x16x16xf32>
    %25 = arith.subf %24, %0 : vector<2x1x16x16xf32>
    %cst_15 = arith.constant -9.21034049 : f32
    %cst_16 = arith.constant -1.000050e-04 : f32
    %26 = vector.broadcast %cst_15 : f32 to vector<2x1x16x16xf32>
    %27 = arith.maximumf %26, %25 : vector<2x1x16x16xf32>
    %28 = vector.broadcast %cst_16 : f32 to vector<2x1x16x16xf32>
    %29 = arith.minimumf %28, %27 : vector<2x1x16x16xf32>
    %cst_17 = arith.constant 1.000000e+00 : f32
    %30 = vector.broadcast %cst_17 : f32 to vector<2x1x16x16xf32>
    %31 = arith.cmpf oeq, %1, %30 : vector<2x1x16x16xf32>
    %cst_18 = arith.constant 1.000000e+00 : f32
    %32 = vector.broadcast %cst_18 : f32 to vector<2x1x16x16xf32>
    %33 = arith.cmpf olt, %1, %32 : vector<2x1x16x16xf32>
    %34 = arith.extui %31 : vector<2x1x16x16xi1> to vector<2x1x16x16xi32>
    %35 = arith.sitofp %34 : vector<2x1x16x16xi32> to vector<2x1x16x16xf32>
    %cst_19 = arith.constant 1.000000e+00 : f32
    %36 = vector.broadcast %cst_19 : f32 to vector<2x1x16x16xf32>
    %37 = arith.subf %36, %17 : vector<2x1x16x16xf32>
    %38 = arith.mulf %37, %37 : vector<2x1x16x16xf32>
    %39 = arith.mulf %24, %38 : vector<2x1x16x16xf32>
    %40 = arith.mulf %29, %17 : vector<2x1x16x16xf32>
    %41 = arith.mulf %40, %17 : vector<2x1x16x16xf32>
    %cst_20 = arith.constant 1.000000e+00 : f32
    %42 = vector.broadcast %cst_20 : f32 to vector<2x1x16x16xf32>
    %43 = arith.subf %42, %1 : vector<2x1x16x16xf32>
    %44 = arith.mulf %43, %43 : vector<2x1x16x16xf32>
    %45 = arith.mulf %44, %44 : vector<2x1x16x16xf32>
    %46 = arith.mulf %41, %45 : vector<2x1x16x16xf32>
    %cst_21 = arith.constant 0.000000e+00 : f32
    %47 = vector.broadcast %cst_21 : f32 to vector<2x1x16x16xf32>
    %48 = arith.select %33, %46, %47 : vector<2x1x16x16xi1>, vector<2x1x16x16xf32>
    %49 = arith.select %31, %39, %48 : vector<2x1x16x16xi1>, vector<2x1x16x16xf32>
    %cst_22 = arith.constant dense<0.000000e+00> : vector<1x16x16xf32>
    %50 = vector.multi_reduction <add>, %49, %cst_22 [0] : vector<2x1x16x16xf32> to vector<1x16x16xf32>
    %cst_23 = arith.constant dense<0.000000e+00> : vector<16x16xf32>
    %51 = vector.multi_reduction <add>, %50, %cst_23 [0] : vector<1x16x16xf32> to vector<16x16xf32>
    %cst_24 = arith.constant dense<0.000000e+00> : vector<16xf32>
    %52 = vector.multi_reduction <add>, %51, %cst_24 [0] : vector<16x16xf32> to vector<16xf32>
    %53 = vector.shape_cast %52 : vector<16xf32> to vector<1x16xf32>
    %c0_25 = arith.constant 0 : index
    %c0_26 = arith.constant 0 : index
    %c0_27 = arith.constant 0 : index
    %54 = vector.load %arg3[%c0_25, %c0_26, %c0_27] : memref<1x2x16xf32, #tpu.memory_space<vmem>>, vector<1x1x16xf32>
    %55 = vector.shape_cast %54 : vector<1x1x16xf32> to vector<1x16xf32>
    %56 = vector.shape_cast %53 : vector<1x16xf32> to vector<1x1x16xf32>
    tpu.vector_store %arg3[%c0_25, %c0_26, %c0_27], %56 {strides = array<i32>} : memref<1x2x16xf32, #tpu.memory_space<vmem>>, vector<1x1x16xf32>,
    %cst_28 = arith.constant dense<0.000000e+00> : vector<1x16x16xf32>
    %57 = vector.multi_reduction <add>, %35, %cst_28 [0] : vector<2x1x16x16xf32> to vector<1x16x16xf32>
    %cst_29 = arith.constant dense<0.000000e+00> : vector<16x16xf32>
    %58 = vector.multi_reduction <add>, %57, %cst_29 [0] : vector<1x16x16xf32> to vector<16x16xf32>
    %cst_30 = arith.constant dense<0.000000e+00> : vector<16xf32>
    %59 = vector.multi_reduction <add>, %58, %cst_30 [0] : vector<16x16xf32> to vector<16xf32>
    %60 = vector.shape_cast %59 : vector<16xf32> to vector<1x16xf32>
    %c0_31 = arith.constant 0 : index
    %c1 = arith.constant 1 : index
    %c0_32 = arith.constant 0 : index
    %61 = vector.load %arg3[%c0_31, %c1, %c0_32] : memref<1x2x16xf32, #tpu.memory_space<vmem>>, vector<1x1x16xf32>
    %62 = vector.shape_cast %61 : vector<1x1x16xf32> to vector<1x16xf32>
    %63 = vector.shape_cast %60 : vector<1x16xf32> to vector<1x1x16xf32>
    tpu.vector_store %arg3[%c0_31, %c1, %c0_32], %63 {strides = array<i32>} : memref<1x2x16xf32, #tpu.memory_space<vmem>>, vector<1x1x16xf32>,
    return
  }
  func.func @transform_0(%arg0: i32) -> (i32, i32, i32, i32) {
    %c0_i32 = arith.constant 0 : i32
    %c0_i32_0 = arith.constant 0 : i32
    %c0_i32_1 = arith.constant 0 : i32
    %c0_i32_2 = arith.constant 0 : i32
    return %arg0, %c0_i32, %c0_i32_0, %c0_i32_1 : i32, i32, i32, i32
  }
  func.func @transform_1(%arg0: i32) -> (i32, i32, i32, i32) {
    %c0_i32 = arith.constant 0 : i32
    %c0_i32_0 = arith.constant 0 : i32
    %c0_i32_1 = arith.constant 0 : i32
    %c0_i32_2 = arith.constant 0 : i32
    return %arg0, %c0_i32, %c0_i32_0, %c0_i32_1 : i32, i32, i32, i32
  }
  func.func @transform_2(%arg0: i32) -> (i32, i32, i32) {
    %c0_i32 = arith.constant 0 : i32
    %c0_i32_0 = arith.constant 0 : i32
    %c0_i32_1 = arith.constant 0 : i32
    return %arg0, %c0_i32, %c0_i32_0 : i32, i32, i32
  }
}

</mosaic_0001>

<bundles_post_ra>
// kernel: tpu_custom_call.1
= control target key start
LH: loop header
LB: loop body
LE: loop exit
PB: predicated region body
PF: predicated region fallthrough
CT: control target
= control target key end

     0   :  { %7 = vsyncpa [#allocation3], 0  ;;  %s442_s0 = inlined_call_operand.hbm [shape: f32[2,1,16,16], index: 0, kind: input, shape index: {}]   ;;  %s443_s1 = inlined_call_operand.hbm [shape: f32[2,1,16,16], index: 1, kind: input, shape index: {}]   ;;  %s444_s2 = inlined_call_operand.hbm [shape: f32[1,2,16], index: 2, kind: output, shape index: {}]  }
   0x1   :  { %8 = vsyncpa [#allocation6], 0 }
   0x2   :  { %9 = vsyncpa [#allocation4], 0  ;;  %s338_s9 = smov [#allocation2]  }
   0x3   :  { %s15_s10 = sshll.u32 %s338_s9, 4  ;;  %s16_s10 = int_to_ptr.vmem [resolvable:$true] %s15_s10 }
   0x4   :  { %s280_s11 = scalar_lea.vmem %s16_s10, 512  ;;  %p285_p1 = scmp.lt.s32.totalorder %s16_s10, %s16_s10 }
   0x5   :  { %p281_p0 = scmp.ne.s32.totalorder %s16_s10, %s280_s11  ;;  %p286_p2 = scmp.lt.s32.totalorder %s280_s11, %s280_s11 }
   0x7   :  { %p287_p3 = por %p286_p2, %p285_p1 }
   0x9   :  { %p288_p4 = pnand %p287_p3, %p281_p0 }
   0xb   :  { %291 = shalt.err (!%p288_p4)
}
   0xc   :  { %s339_s12 = smov 128   ;;  %s340_s13 = smov 8  }
   0xd   :  { %21 = dma.hbm_to_vmem [thread:$0]  %s442_s0, 512, %s16_s10, [#allocation3], %s339_s12, %s339_s12, %s340_s13  }
   0xe   :  { %s341_s16 = smov [#allocation5]  }
   0xf   :  { %s27_s17 = sshll.u32 %s341_s16, 4  ;;  %s28_s17 = int_to_ptr.vmem [resolvable:$true] %s27_s17 }
  0x10   :  { %s300_s18 = scalar_lea.vmem %s28_s17, 512  ;;  %p305_p6 = scmp.lt.s32.totalorder %s28_s17, %s28_s17 }
  0x11   :  { %p301_p5 = scmp.ne.s32.totalorder %s28_s17, %s300_s18  ;;  %p306_p7 = scmp.lt.s32.totalorder %s300_s18, %s300_s18 }
  0x13   :  { %p307_p8 = por %p306_p7, %p305_p6 }
  0x15   :  { %p308_p9 = pnand %p307_p8, %p301_p5 }
  0x17   :  { %311 = shalt.err (!%p308_p9)
}
  0x18   :  { %33 = dma.hbm_to_vmem [thread:$0]  %s443_s1, 512, %s28_s17, [#allocation6], %s339_s12, %s339_s12, %s340_s13  }
  0x19   :  { %332 = dma.done.wait [#allocation3], 512  }
  0x1a   :  { %333 = vsyncadd [#allocation3], 4294966784 }
  0x1b   :  { %334 = dma.done.wait [#allocation6], 512  }
  0x1c   :  { %335 = vsyncadd [#allocation6], 4294966784  ;;  %v365_v0 = vld [vmem:[#allocation2] sm:$0xff]  ;;  %v367_v1 = vld [vmem:[#allocation2 + $0x8] sm:$0xff]  ;;  %vm184_vm4 = vcmask 130048   ;;  %v342_v20 = vmov 0.0  }
  0x1d   :  { %v369_v2 = vld [vmem:[#allocation2 + $0x10] sm:$0xff]  ;;  %v371_v3 = vld [vmem:[#allocation2 + $0x18] sm:$0xff]  ;;  %v48_v4 = vsub.f32 0.0, %v365_v0  ;;  %v49_v5 = vsub.f32 0.0, %v367_v1  ;;  %v377_v8 = vld [vmem:[#allocation5] sm:$0xff]  ;;  %vm202_vm5 = vcmask 122880  }
  0x1e   :  { %v50_v6 = vsub.f32 0.0, %v369_v2  ;;  %v51_v7 = vsub.f32 0.0, %v371_v3  ;;  %v379_v12 = vld [vmem:[#allocation5 + $0x8] sm:$0xff]  ;;  %v381_v13 = vld [vmem:[#allocation5 + $0x10] sm:$0xff]  ;;  %vm124_vm0 = vcmp.eq.f32.partialorder %v377_v8, 1.0  ;;  %v384_v18 = vld [vmem:[#allocation5 + $0x18] sm:$0xff] }
  0x1f   :  { %v52_v9 = vmin.f32 %v48_v4, 60.0  ;;  %v53_v10 = vmin.f32 %v49_v5, 60.0  ;;  %vm125_vm1 = vcmp.eq.f32.partialorder %v379_v12, 1.0  ;;  %vm126_vm2 = vcmp.eq.f32.partialorder %v381_v13, 1.0  ;;  %s343_s0 = smov [#allocation7]  }
  0x20   :  { %v54_v11 = vmin.f32 %v50_v6, 60.0  ;;  %v55_v14 = vmin.f32 %v51_v7, 60.0  ;;  %vm127_vm3 = vcmp.eq.f32.partialorder %v384_v18, 1.0  ;;  %v238_v21 = vsel %vm124_vm0, 1.0, %v342_v20  ;;  %s228_s1 = sshll.u32 %s343_s0, 4  ;;  %s229_s1 = int_to_ptr.vmem [resolvable:$true] %s228_s1 }
  0x21   :  { %v56_v15 = vmul.f32 1.442695, %v52_v9  ;;  %v58_v16 = vmul.f32 1.442695, %v53_v10  ;;  %v239_v22 = vsel %vm125_vm1, 1.0, %v342_v20  ;;  %v240_v23 = vsel %vm126_vm2, 1.0, %v342_v20  ;;  %p317_p11 = scmp.lt.s32.totalorder %s229_s1, %s229_s1 }
  0x22   :  { %v60_v17 = vmul.f32 1.442695, %v54_v11  ;;  %v62_v19 = vmul.f32 1.442695, %v55_v14  ;;  %v241_v24 = vsel %vm127_vm3, 1.0, %v342_v20  ;;  %v204_v25 = vsel %vm184_vm4, %v238_v21, 0.0 }
  0x23   :  { %248 = vpow2.f32 %v56_v15  ;;  %v205_v26 = vsel %vm184_vm4, %v240_v23, 0.0  ;;  %v207_v28 = vsel %vm184_vm4, %v239_v22, 0.0  ;;  %v208_v29 = vsel %vm184_vm4, %v241_v24, 0.0  ;;  %s312_s21 = scalar_lea.vmem %s229_s1, 32 }
  0x24   :  { %250 = vpow2.f32 %v58_v16  ;;  %v206_v27 = vadd.f32 %v205_v26, %v204_v25  ;;  %v209_v30 = vadd.f32 %v208_v29, %v207_v28  ;;  %v160_v22 = vsub.f32 1.0, %v377_v8  ;;  %p313_p10 = scmp.ne.s32.totalorder %s229_s1, %s312_s21  ;;  %p318_p12 = scmp.lt.s32.totalorder %s312_s21, %s312_s21 }
  0x25   :  { %252 = vpow2.f32 %v60_v17  ;;  %v161_v26 = vsub.f32 1.0, %v379_v12  ;;  %vm128_vm6 = vcmp.lt.f32.partialorder %v377_v8, 1.0  ;;  %vm129_vm7 = vcmp.lt.f32.partialorder %v379_v12, 1.0 }
  0x26   :  { %254 = vpow2.f32 %v62_v19  ;;  %v212_v31 = vsel %vm184_vm4, %v206_v27, 0.0  ;;  %v213_v32 = vsel %vm184_vm4, %v209_v30, 0.0  ;;  %vm130_vm8 = vcmp.lt.f32.partialorder %v381_v13, 1.0  ;;  %p319_p13 = por %p318_p12, %p317_p11 }
  0x27   :  { %v214_v33 = vadd.f32 %v213_v32, %v212_v31  ;;  %vm131_vm9 = vcmp.lt.f32.partialorder %v384_v18, 1.0 }
  0x28   :  { %p320_p0 = pnand %p319_p13, %p313_p10 }
  0x29   :  { %v215_v34 = vrot.slane %v214_v33, 4 }
  0x2b   :  { %v216_v36 = vadd.f32 %v215_v34, %v214_v33 }
  0x2d   :  { %v217_v41 = vrot.slane %v216_v36, 2 }
  0x2f   :  { %v218_v45 = vadd.f32 %v217_v41, %v216_v36 }
  0x30   :  { %v249_v35 = vpop.eup %248 }
  0x31   :  { %v251_v37 = vpop.eup %250  ;;  %v64_v38 = vadd.f32 1.0, %v249_v35  ;;  %v219_v46 = vrot.slane %v218_v45, 1 }
  0x32   :  { %v253_v39 = vpop.eup %252  ;;  %v65_v40 = vadd.f32 1.0, %v251_v37 }
  0x33   :  { %v255_v42 = vpop.eup %254  ;;  %v66_v43 = vadd.f32 1.0, %v253_v39  ;;  %256 = vrcp.f32 %v64_v38  ;;  %v220_v47 = vadd.f32 %v219_v46, %v218_v45  ;;  %v163_v39 = vsub.f32 1.0, %v384_v18 }
  0x34   :  { %v67_v44 = vadd.f32 1.0, %v255_v42  ;;  %258 = vrcp.f32 %v65_v40  ;;  %v164_v42 = vmul.f32 %v160_v22, %v160_v22 }
  0x35   :  { %260 = vrcp.f32 %v66_v43  ;;  %221 = vst.msk [vmem:[#allocation7 + $0x1] sm:$0x1] %vm202_vm5, %v220_v47 }
  0x36   :  { %262 = vrcp.f32 %v67_v44 }
  0x37   :  { %264 = vlog2.f32 %v64_v38 }
  0x38   :  { %266 = vlog2.f32 %v65_v40 }
  0x39   :  { %268 = vlog2.f32 %v66_v43 }
  0x3a   :  { %270 = vlog2.f32 %v67_v44 }
  0x40   :  { %v257_v48 = vpop.eup %256 }
  0x41   :  { %v259_v49 = vpop.eup %258  ;;  %v72_v50 = vmul.f32 %v257_v48, %v64_v38  ;;  %v162_v38 = vsub.f32 1.0, %v381_v13 }
  0x42   :  { %v261_v51 = vpop.eup %260  ;;  %v73_v52 = vmul.f32 %v259_v49, %v65_v40 }
  0x43   :  { %v263_v53 = vpop.eup %262  ;;  %v74_v54 = vmul.f32 %v261_v51, %v66_v43  ;;  %v76_v55 = vsub.f32 2.0, %v72_v50  ;;  %v165_v43 = vmul.f32 %v161_v26, %v161_v26 }
  0x44   :  { %v265_v56 = vpop.eup %264  ;;  %v75_v57 = vmul.f32 %v263_v53, %v67_v44  ;;  %v77_v58 = vsub.f32 2.0, %v73_v52 }
  0x45   :  { %v267_v59 = vpop.eup %266  ;;  %v78_v60 = vsub.f32 2.0, %v74_v54  ;;  %v80_v61 = vmul.f32 %v257_v48, %v76_v55  ;;  %v93_v62 = vmul.f32 0.6931472, %v265_v56  ;;  %v168_v56 = vmul.f32 %v164_v42, %v164_v42 }
  0x46   :  { %v269_v63 = vpop.eup %268  ;;  %v79_v4 = vsub.f32 2.0, %v75_v57  ;;  %v81_v5 = vmul.f32 %v259_v49, %v77_v58  ;;  %v95_v6 = vmul.f32 0.6931472, %v267_v59 }
  0x47   :  { %v271_v7 = vpop.eup %270  ;;  %v82_v9 = vmul.f32 %v261_v51, %v78_v60  ;;  %v84_v10 = vmax.f32 %v80_v61, 0.0001  ;;  %v97_v11 = vmul.f32 0.6931472, %v269_v63  ;;  %v100_v14 = vsub.f32 0.0, %v93_v62 }
  0x48   :  { %v83_v15 = vmul.f32 %v263_v53, %v79_v4  ;;  %v85_v16 = vmax.f32 %v81_v5, 0.0001  ;;  %v99_v17 = vmul.f32 0.6931472, %v271_v7  ;;  %v101_v19 = vsub.f32 0.0, %v95_v6 }
  0x49   :  { %v86_v20 = vmax.f32 %v82_v9, 0.0001  ;;  %v102_v21 = vsub.f32 0.0, %v97_v11  ;;  %v88_v24 = vmin.f32 %v84_v10, 0.9999  ;;  %v166_v53 = vmul.f32 %v162_v38, %v162_v38 }
  0x4a   :  { %v87_v23 = vmax.f32 %v83_v15, 0.0001  ;;  %v103_v25 = vsub.f32 0.0, %v99_v17  ;;  %v89_v27 = vmin.f32 %v85_v16, 0.9999 }
  0x4b   :  { %v104_v28 = vmax.f32 %v100_v14, -9.2103405  ;;  %v105_v29 = vmax.f32 %v101_v19, -9.2103405  ;;  %v90_v30 = vmin.f32 %v86_v20, 0.9999  ;;  %v170_v6 = vmul.f32 %v166_v53, %v166_v53 }
  0x4c   :  { %v106_v31 = vmax.f32 %v102_v21, -9.2103405  ;;  %v107_v32 = vmax.f32 %v103_v25, -9.2103405  ;;  %v91_v33 = vmin.f32 %v87_v23, 0.9999 }
  0x4d   :  { %v108_v34 = vmin.f32 %v104_v28, -0.000100005  ;;  %v109_v35 = vmin.f32 %v105_v29, -0.000100005  ;;  %v140_v46 = vsub.f32 1.0, %v88_v24  ;;  %v141_v47 = vsub.f32 1.0, %v89_v27 }
  0x4e   :  { %v110_v36 = vmin.f32 %v106_v31, -0.000100005  ;;  %v111_v37 = vmin.f32 %v107_v32, -0.000100005  ;;  %v142_v50 = vsub.f32 1.0, %v90_v30  ;;  %v143_v51 = vsub.f32 1.0, %v91_v33 }
  0x4f   :  { %v112_v40 = vsub.f32 %v108_v34, %v365_v0  ;;  %v113_v41 = vsub.f32 %v109_v35, %v367_v1  ;;  %v167_v1 = vmul.f32 %v163_v39, %v163_v39  ;;  %v144_v58 = vmul.f32 %v140_v46, %v140_v46 }
  0x50   :  { %v114_v44 = vsub.f32 %v110_v36, %v369_v2  ;;  %v115_v45 = vsub.f32 %v111_v37, %v371_v3  ;;  %v169_v2 = vmul.f32 %v165_v43, %v165_v43  ;;  %v145_v59 = vmul.f32 %v141_v47, %v141_v47 }
  0x51   :  { %v116_v48 = vmax.f32 %v112_v40, -9.2103405  ;;  %v117_v49 = vmax.f32 %v113_v41, -9.2103405  ;;  %v146_v60 = vmul.f32 %v142_v50, %v142_v50  ;;  %v147_v61 = vmul.f32 %v143_v51, %v143_v51 }
  0x52   :  { %v118_v52 = vmax.f32 %v114_v44, -9.2103405  ;;  %v119_v0 = vmax.f32 %v115_v45, -9.2103405  ;;  %v171_v7 = vmul.f32 %v167_v1, %v167_v1  ;;  %v148_v11 = vmul.f32 %v144_v58, %v108_v34 }
  0x53   :  { %v120_v54 = vmin.f32 %v116_v48, -0.000100005  ;;  %v121_v55 = vmin.f32 %v117_v49, -0.000100005  ;;  %v149_v14 = vmul.f32 %v145_v59, %v109_v35  ;;  %v150_v17 = vmul.f32 %v146_v60, %v110_v36 }
  0x54   :  { %v122_v57 = vmin.f32 %v118_v52, -0.000100005  ;;  %v123_v3 = vmin.f32 %v119_v0, -0.000100005  ;;  %v151_v19 = vmul.f32 %v147_v61, %v111_v37 }
  0x55   :  { %v152_v62 = vmul.f32 %v120_v54, %v88_v24  ;;  %v153_v63 = vmul.f32 %v121_v55, %v89_v27 }
  0x56   :  { %v154_v4 = vmul.f32 %v122_v57, %v90_v30  ;;  %v155_v5 = vmul.f32 %v123_v3, %v91_v33 }
  0x57   :  { %v156_v9 = vmul.f32 %v152_v62, %v88_v24  ;;  %v157_v10 = vmul.f32 %v153_v63, %v89_v27 }
  0x58   :  { %v158_v15 = vmul.f32 %v154_v4, %v90_v30  ;;  %v159_v16 = vmul.f32 %v155_v5, %v91_v33 }
  0x59   :  { %v172_v20 = vmul.f32 %v168_v56, %v156_v9  ;;  %v173_v21 = vmul.f32 %v169_v2, %v157_v10 }
  0x5a   :  { %v174_v22 = vmul.f32 %v170_v6, %v158_v15  ;;  %v175_v23 = vmul.f32 %v171_v7, %v159_v16 }
  0x5b   :  { %v176_v25 = vsel %vm128_vm6, %v172_v20, 0.0  ;;  %v177_v26 = vsel %vm129_vm7, %v173_v21, 0.0 }
  0x5c   :  { %v178_v24 = vsel %vm130_vm8, %v174_v22, 0.0  ;;  %v179_v27 = vsel %vm131_vm9, %v175_v23, 0.0  ;;  %v180_v28 = vsel %vm124_vm0, %v148_v11, %v176_v25  ;;  %v181_v29 = vsel %vm125_vm1, %v149_v14, %v177_v26 }
  0x5d   :  { %v182_v30 = vsel %vm126_vm2, %v150_v17, %v178_v24  ;;  %v183_v31 = vsel %vm127_vm3, %v151_v19, %v179_v27  ;;  %v185_v32 = vsel %vm184_vm4, %v180_v28, 0.0  ;;  %v188_v33 = vsel %vm184_vm4, %v181_v29, 0.0 }
  0x5e   :  { %v186_v34 = vsel %vm184_vm4, %v182_v30, 0.0  ;;  %v189_v35 = vsel %vm184_vm4, %v183_v31, 0.0 }
  0x5f   :  { %v187_v36 = vadd.f32 %v186_v34, %v185_v32  ;;  %v190_v8 = vadd.f32 %v189_v35, %v188_v33 }
  0x61   :  { %v193_v37 = vsel %vm184_vm4, %v187_v36, 0.0  ;;  %v194_v12 = vsel %vm184_vm4, %v190_v8, 0.0 }
  0x62   :  { %v195_v38 = vadd.f32 %v194_v12, %v193_v37 }
  0x64   :  { %v196_v13 = vrot.slane %v195_v38, 4 }
  0x66   :  { %v197_v39 = vadd.f32 %v196_v13, %v195_v38 }
  0x68   :  { %v198_v40 = vrot.slane %v197_v39, 2 }
  0x6a   :  { %v199_v18 = vadd.f32 %v198_v40, %v197_v39 }
  0x6c   :  { %v200_v41 = vrot.slane %v199_v18, 1 }
  0x6e   :  { %v201_v42 = vadd.f32 %v200_v41, %v199_v18 }
  0x70   :  { %203 = vst.msk [vmem:[#allocation7] sm:$0x1] %vm202_vm5, %v201_v42 }
  0x71   :  { %323 = shalt.err (!%p320_p0)
}
  0x72   :  { %231 = dma.vmem_to_hbm [thread:$0]  %s229_s1, 32, %s444_s2, [#allocation4]  }
  0x73   :  { %336 = dma.done.wait [#allocation4], 32  }
  0x74   :  { %337 = vsyncadd [#allocation4], 4294967264 }
  0x75   :  { %235 = vsyncpa [#allocation3], 1 }
  0x76   :  { %236 = vsyncpa [#allocation6], 1 }
  0x77   :  { %237 = vsyncpa [#allocation4], 1 }

</bundles_post_ra>
